<compile_context>
chip_gen: v7x
topology: tpu7x:2x2x1
jax: 0.10.0
libtpu: 0.0.40
codegen_flags: <defaults>
</compile_context>

<pallas_src>
import functools

import numpy as np
import jax
import jax.numpy as jnp
from jax.experimental import pallas as pl
from jax.experimental.pallas import tpu as pltpu

_NEG = -1e30  # large finite negative bias (avoids NaN from -inf - -inf)


def _transformer_kernel(q_ref, k_ref, mask_ref,
                        wq_ref, wk_ref, wv_ref, bq_ref, bk_ref, bv_ref,
                        sel_ref, w1_ref, b1_ref, w2_ref, b2_ref,
                        out_ref, *, num_heads, head_dim):
    H, D = num_heads, head_dim
    lq, emb = q_ref.shape
    lk = k_ref.shape[0]
    scale = 1.0 / (float(D) ** 0.5)
    f32, bf16 = jnp.float32, jnp.bfloat16

    q = q_ref[...]                                   # [Lq, E] f32 (kept for residual)
    k = k_ref[...]                                   # [Lk, E] f32

    # Head-batched projections: per-head weights [H, E, D] -> no lane slicing.
    q_b = jnp.broadcast_to(q.astype(bf16), (H, lq, emb))
    k_b = jnp.broadcast_to(k.astype(bf16), (H, lk, emb))
    Qh = jnp.einsum('hle,hed->hld', q_b, wq_ref[...],
                    preferred_element_type=f32) + bq_ref[...]        # [H, Lq, D]
    Kh = jnp.einsum('hle,hed->hld', k_b, wk_ref[...],
                    preferred_element_type=f32) + bk_ref[...]        # [H, Lk, D]
    Vh = jnp.einsum('hle,hed->hld', k_b, wv_ref[...],
                    preferred_element_type=f32) + bv_ref[...]        # [H, Lk, D]

    # Scores [H, Lq, Lk]; additive key-mask bias built in-kernel from the raw mask.
    scores = jnp.einsum('hqd,hkd->hqk', Qh.astype(bf16), Kh.astype(bf16),
                        preferred_element_type=f32) * scale
    bias = jnp.where(mask_ref[...] != 0, 0.0, _NEG).astype(f32)      # [1, Lk]
    scores = scores + bias[None]                                     # bcast over H, Lq

    # Softmax in f32.  NOTE: a fully-masked key row yields a uniform
    # distribution here instead of the reference's -inf/NaN (degenerate case).
    m = jnp.max(scores, axis=-1, keepdims=True)
    e = jnp.exp(scores - m)
    s = jnp.sum(e, axis=-1, keepdims=True)
    probs = e * pl.reciprocal(s, approx=True)                        # EUP reciprocal

    ctx = jnp.einsum('hqk,hkd->hqd', probs.astype(bf16), Vh.astype(bf16),
                     preferred_element_type=f32)                     # [H, Lq, D]

    # Head merge + residual: place each head's context into its column slot via
    # exact 0/1 selector matmuls (MXU) -- no lane concatenates / relayouts.
    attn = q                                                         # E == num_units
    for h in range(H):                                               # static, tiny
        attn = attn + jnp.dot(ctx[h], sel_ref[h], preferred_element_type=f32)

    # Feed-forward: fw2(relu(fw1(x))) + residual   (dropout_rate=0.0 -> identity)
    h1 = jnp.dot(attn.astype(bf16), w1_ref[...], preferred_element_type=f32) + b1_ref[...]
    h1 = jnp.maximum(h1, 0.0)
    ff = jnp.dot(h1.astype(bf16), w2_ref[...], preferred_element_type=f32) + b2_ref[...]
    out_ref[...] = ff + attn


def transformer_forward(queries, keys, keys_mask, params, *, num_heads, head_dim):
    B, Lq, E = queries.shape
    _, Lk, _ = keys.shape
    H, D = num_heads, head_dim
    U = H * D
    hidden = 4 * U
    assert E == U, "residual connection requires embedding_size == num_units"

    f32, bf16 = jnp.float32, jnp.bfloat16

    # Per-head projection weights [H, E, D] (bf16 for the MXU), biases [H, 1, D] f32.
    def split_w(w):   # [E, U] -> [H, E, D]
        return jnp.transpose(w.reshape(E, H, D), (1, 0, 2)).astype(bf16)

    def split_b(b):   # [U] -> [H, 1, D]
        return b.reshape(H, 1, D).astype(f32)

    wq, wk, wv = split_w(params["wq"]), split_w(params["wk"]), split_w(params["wv"])
    bq, bk, bv = split_b(params["bq"]), split_b(params["bk"]), split_b(params["bv"])

    # 0/1 selector placing head h's [Lq, D] context into columns h*D:(h+1)*D.
    sel = jnp.asarray(np.eye(U, dtype=np.float32).reshape(H, D, U))

    w1 = params["w1"].astype(bf16)
    b1 = params["b1"].reshape(1, hidden).astype(f32)
    w2 = params["w2"].astype(bf16)
    b2 = params["b2"].reshape(1, U).astype(f32)

    if keys_mask is None:
        keys_mask = jnp.ones((B, Lk), dtype=bool)
    mask_i32 = keys_mask.astype(jnp.int32).reshape(B, 1, Lk)

    kernel = functools.partial(_transformer_kernel, num_heads=H, head_dim=D)

    const3 = lambda b: (0, 0, 0)
    const2 = lambda b: (0, 0)

    out = pl.pallas_call(
        kernel,
        grid=(B,),
        in_specs=[
            pl.BlockSpec((None, Lq, E), lambda b: (b, 0, 0)),   # queries (batch squeezed)
            pl.BlockSpec((None, Lk, E), lambda b: (b, 0, 0)),   # keys
            pl.BlockSpec((None, 1, Lk), lambda b: (b, 0, 0)),   # int32 key mask
            pl.BlockSpec((H, E, D), const3),                    # wq (per-head)
            pl.BlockSpec((H, E, D), const3),                    # wk
            pl.BlockSpec((H, E, D), const3),                    # wv
            pl.BlockSpec((H, 1, D), const3),                    # bq
            pl.BlockSpec((H, 1, D), const3),                    # bk
            pl.BlockSpec((H, 1, D), const3),                    # bv
            pl.BlockSpec((H, D, U), const3),                    # head-merge selector
            pl.BlockSpec((U, hidden), const2),                  # w1
            pl.BlockSpec((1, hidden), const2),                  # b1
            pl.BlockSpec((hidden, U), const2),                  # w2
            pl.BlockSpec((1, U), const2),                       # b2
        ],
        out_specs=pl.BlockSpec((None, Lq, U), lambda b: (b, 0, 0)),
        out_shape=jax.ShapeDtypeStruct((B, Lq, U), jnp.float32),
        compiler_params=pltpu.CompilerParams(
            dimension_semantics=("parallel",)),
    )(queries.astype(f32), keys.astype(f32), mask_i32,
      wq, wk, wv, bq, bk, bv, sel, w1, b1, w2, b2)
    return out


def _reference_forward(queries, keys, keys_mask, params, *, num_heads, head_dim):
    """Pure-JAX f32 reference mirroring the PyTorch forward."""
    B, Lq, E = queries.shape
    _, Lk, _ = keys.shape
    Q = queries @ params["wq"] + params["bq"]
    K = keys @ params["wk"] + params["bk"]
    V = keys @ params["wv"] + params["bv"]
    Q_ = Q.reshape(B, Lq, num_heads, head_dim).transpose(0, 2, 1, 3)
    K_ = K.reshape(B, Lk, num_heads, head_dim).transpose(0, 2, 1, 3)
    V_ = V.reshape(B, Lk, num_heads, head_dim).transpose(0, 2, 1, 3)
    scores = jnp.einsum("bhqd,bhkd->bhqk", Q_, K_) / (head_dim ** 0.5)
    scores = jnp.where(keys_mask[:, None, None, :], scores, -jnp.inf)
    probs = jax.nn.softmax(scores, axis=-1)
    out = jnp.einsum("bhqk,bhkd->bhqd", probs, V_)
    out = out.transpose(0, 2, 1, 3).reshape(B, Lq, num_heads * head_dim)
    out = out + queries
    ff = jax.nn.relu(out @ params["w1"] + params["b1"]) @ params["w2"] + params["b2"]
    return ff + out


if __name__ == "__main__":
    # Small shapes consistent with the module
    B, Lq, Lk = 2, 8, 8
    head_dim, num_heads = 8, 4
    E = num_units = head_dim * num_heads      # 32 (residual requires E == num_units)
    hidden = 4 * num_units

    key = jax.random.PRNGKey(0)
    ks = jax.random.split(key, 12)
    params = {
        "wq": 0.1 * jax.random.normal(ks[0], (E, num_units), jnp.float32),
        "bq": 0.1 * jax.random.normal(ks[1], (num_units,), jnp.float32),
        "wk": 0.1 * jax.random.normal(ks[2], (E, num_units), jnp.float32),
        "bk": 0.1 * jax.random.normal(ks[3], (num_units,), jnp.float32),
        "wv": 0.1 * jax.random.normal(ks[4], (E, num_units), jnp.float32),
        "bv": 0.1 * jax.random.normal(ks[5], (num_units,), jnp.float32),
        "w1": 0.1 * jax.random.normal(ks[6], (num_units, hidden), jnp.float32),
        "b1": 0.1 * jax.random.normal(ks[7], (hidden,), jnp.float32),
        "w2": 0.1 * jax.random.normal(ks[8], (hidden, num_units), jnp.float32),
        "b2": 0.1 * jax.random.normal(ks[9], (num_units,), jnp.float32),
    }

    queries = jax.random.normal(ks[10], (B, Lq, E), jnp.float32)
    keys = jax.random.normal(ks[11], (B, Lk, E), jnp.float32)
    # boolean keys_mask: last two key positions of batch 1 are masked out
    keys_mask = jnp.ones((B, Lk), dtype=bool).at[1, -2:].set(False)

    out = transformer_forward(queries, keys, keys_mask, params,
                              num_heads=num_heads, head_dim=head_dim)
    out = jax.block_until_ready(out)

    ref = _reference_forward(queries, keys, keys_mask, params,
                             num_heads=num_heads, head_dim=head_dim)
    assert out.shape == (B, Lq, num_units)
    # tolerance accounts for bf16 MXU operands + EUP approximate reciprocal
    assert jnp.allclose(out, ref, atol=3e-2, rtol=3e-2), "mismatch vs reference"

    print("KERNEL_OK")
</pallas_src>

<mosaic_0001>
module attributes {stable_mosaic.version = 11 : i64} {
  func.func @_transformer_kernel(%arg0: i32, %arg1: memref<1x8x32xf32, #tpu.memory_space<vmem>>, %arg2: memref<1x8x32xf32, #tpu.memory_space<vmem>>, %arg3: memref<1x1x8xi32, #tpu.memory_space<vmem>>, %arg4: memref<4x32x8xbf16, #tpu.memory_space<vmem>>, %arg5: memref<4x32x8xbf16, #tpu.memory_space<vmem>>, %arg6: memref<4x32x8xbf16, #tpu.memory_space<vmem>>, %arg7: memref<4x1x8xf32, #tpu.memory_space<vmem>>, %arg8: memref<4x1x8xf32, #tpu.memory_space<vmem>>, %arg9: memref<4x1x8xf32, #tpu.memory_space<vmem>>, %arg10: memref<4x8x32xf32, #tpu.memory_space<vmem>>, %arg11: memref<32x128xbf16, #tpu.memory_space<vmem>>, %arg12: memref<1x128xf32, #tpu.memory_space<vmem>>, %arg13: memref<128x32xbf16, #tpu.memory_space<vmem>>, %arg14: memref<1x32xf32, #tpu.memory_space<vmem>>, %arg15: memref<1x8x32xf32, #tpu.memory_space<vmem>>) attributes {dimension_semantics = [#tpu.dimension_semantics<parallel>], iteration_bounds = array<i64: 2>, scalar_prefetch = 0 : i64, scratch_operands = 0 : i64, tpu.core_type = #tpu.core_type<tc>, window_params = [{transform_indices = @transform_0, window_bounds = array<i64: 1, 8, 32>}, {transform_indices = @transform_1, window_bounds = array<i64: 1, 8, 32>}, {transform_indices = @transform_2, window_bounds = array<i64: 1, 1, 8>}, {pipeline_mode = #tpu.pipeline_mode<synchronous>, transform_indices = @transform_3, window_bounds = array<i64: 4, 32, 8>}, {pipeline_mode = #tpu.pipeline_mode<synchronous>, transform_indices = @transform_4, window_bounds = array<i64: 4, 32, 8>}, {pipeline_mode = #tpu.pipeline_mode<synchronous>, transform_indices = @transform_5, window_bounds = array<i64: 4, 32, 8>}, {pipeline_mode = #tpu.pipeline_mode<synchronous>, transform_indices = @transform_6, window_bounds = array<i64: 4, 1, 8>}, {pipeline_mode = #tpu.pipeline_mode<synchronous>, transform_indices = @transform_7, window_bounds = array<i64: 4, 1, 8>}, {pipeline_mode = #tpu.pipeline_mode<synchronous>, transform_indices = @transform_8, window_bounds = array<i64: 4, 1, 8>}, {pipeline_mode = #tpu.pipeline_mode<synchronous>, transform_indices = @transform_9, window_bounds = array<i64: 4, 8, 32>}, {pipeline_mode = #tpu.pipeline_mode<synchronous>, transform_indices = @transform_10, window_bounds = array<i64: 32, 128>}, {pipeline_mode = #tpu.pipeline_mode<synchronous>, transform_indices = @transform_11, window_bounds = array<i64: 1, 128>}, {pipeline_mode = #tpu.pipeline_mode<synchronous>, transform_indices = @transform_12, window_bounds = array<i64: 128, 32>}, {pipeline_mode = #tpu.pipeline_mode<synchronous>, transform_indices = @transform_13, window_bounds = array<i64: 1, 32>}, {transform_indices = @transform_14, window_bounds = array<i64: 1, 8, 32>}]} {
    %c0 = arith.constant 0 : index
    %c0_0 = arith.constant 0 : index
    %c0_1 = arith.constant 0 : index
    %0 = vector.load %arg1[%c0, %c0_0, %c0_1] : memref<1x8x32xf32, #tpu.memory_space<vmem>>, vector<1x8x32xf32>
    %1 = vector.shape_cast %0 : vector<1x8x32xf32> to vector<8x32xf32>
    %c0_2 = arith.constant 0 : index
    %c0_3 = arith.constant 0 : index
    %c0_4 = arith.constant 0 : index
    %2 = vector.load %arg2[%c0_2, %c0_3, %c0_4] : memref<1x8x32xf32, #tpu.memory_space<vmem>>, vector<1x8x32xf32>
    %3 = vector.shape_cast %2 : vector<1x8x32xf32> to vector<8x32xf32>
    %4 = arith.truncf %1 : vector<8x32xf32> to vector<8x32xbf16>
    %5 = vector.shape_cast %4 : vector<8x32xbf16> to vector<1x8x32xbf16>
    %6 = vector.broadcast %5 : vector<1x8x32xbf16> to vector<4x8x32xbf16>
    %7 = arith.truncf %3 : vector<8x32xf32> to vector<8x32xbf16>
    %8 = vector.shape_cast %7 : vector<8x32xbf16> to vector<1x8x32xbf16>
    %9 = vector.broadcast %8 : vector<1x8x32xbf16> to vector<4x8x32xbf16>
    %c0_5 = arith.constant 0 : index
    %c0_6 = arith.constant 0 : index
    %c0_7 = arith.constant 0 : index
    %10 = vector.load %arg4[%c0_5, %c0_6, %c0_7] : memref<4x32x8xbf16, #tpu.memory_space<vmem>>, vector<4x32x8xbf16>
    "tpu.trace_start"() <{level = 10 : i32, message = "hle,hed->hld"}> : () -> ()
    %cst = arith.constant dense<0.000000e+00> : vector<4x8x8xf32>
    %11 = tpu.matmul %6, %10, %cst {dimension_numbers = #tpu.dot_dimension_numbers<[2], [1], [1], [2], [0, 0, 0, 1, 1, 2], [0], [0]>} : vector<4x8x32xbf16>, vector<4x32x8xbf16>, vector<4x8x8xf32> -> vector<4x8x8xf32>
    "tpu.trace_stop"() : () -> ()
    %c0_8 = arith.constant 0 : index
    %c0_9 = arith.constant 0 : index
    %c0_10 = arith.constant 0 : index
    %12 = vector.load %arg7[%c0_8, %c0_9, %c0_10] : memref<4x1x8xf32, #tpu.memory_space<vmem>>, vector<4x1x8xf32>
    %13 = vector.broadcast %12 : vector<4x1x8xf32> to vector<4x8x8xf32>
    %14 = arith.addf %11, %13 : vector<4x8x8xf32>
    %c0_11 = arith.constant 0 : index
    %c0_12 = arith.constant 0 : index
    %c0_13 = arith.constant 0 : index
    %15 = vector.load %arg5[%c0_11, %c0_12, %c0_13] : memref<4x32x8xbf16, #tpu.memory_space<vmem>>, vector<4x32x8xbf16>
    "tpu.trace_start"() <{level = 10 : i32, message = "hle,hed->hld"}> : () -> ()
    %cst_14 = arith.constant dense<0.000000e+00> : vector<4x8x8xf32>
    %16 = tpu.matmul %9, %15, %cst_14 {dimension_numbers = #tpu.dot_dimension_numbers<[2], [1], [1], [2], [0, 0, 0, 1, 1, 2], [0], [0]>} : vector<4x8x32xbf16>, vector<4x32x8xbf16>, vector<4x8x8xf32> -> vector<4x8x8xf32>
    "tpu.trace_stop"() : () -> ()
    %c0_15 = arith.constant 0 : index
    %c0_16 = arith.constant 0 : index
    %c0_17 = arith.constant 0 : index
    %17 = vector.load %arg8[%c0_15, %c0_16, %c0_17] : memref<4x1x8xf32, #tpu.memory_space<vmem>>, vector<4x1x8xf32>
    %18 = vector.broadcast %17 : vector<4x1x8xf32> to vector<4x8x8xf32>
    %19 = arith.addf %16, %18 : vector<4x8x8xf32>
    %c0_18 = arith.constant 0 : index
    %c0_19 = arith.constant 0 : index
    %c0_20 = arith.constant 0 : index
    %20 = vector.load %arg6[%c0_18, %c0_19, %c0_20] : memref<4x32x8xbf16, #tpu.memory_space<vmem>>, vector<4x32x8xbf16>
    "tpu.trace_start"() <{level = 10 : i32, message = "hle,hed->hld"}> : () -> ()
    %cst_21 = arith.constant dense<0.000000e+00> : vector<4x8x8xf32>
    %21 = tpu.matmul %9, %20, %cst_21 {dimension_numbers = #tpu.dot_dimension_numbers<[2], [1], [1], [2], [0, 0, 0, 1, 1, 2], [0], [0]>} : vector<4x8x32xbf16>, vector<4x32x8xbf16>, vector<4x8x8xf32> -> vector<4x8x8xf32>
    "tpu.trace_stop"() : () -> ()
    %c0_22 = arith.constant 0 : index
    %c0_23 = arith.constant 0 : index
    %c0_24 = arith.constant 0 : index
    %22 = vector.load %arg9[%c0_22, %c0_23, %c0_24] : memref<4x1x8xf32, #tpu.memory_space<vmem>>, vector<4x1x8xf32>
    %23 = vector.broadcast %22 : vector<4x1x8xf32> to vector<4x8x8xf32>
    %24 = arith.addf %21, %23 : vector<4x8x8xf32>
    %25 = arith.truncf %14 : vector<4x8x8xf32> to vector<4x8x8xbf16>
    %26 = arith.truncf %19 : vector<4x8x8xf32> to vector<4x8x8xbf16>
    "tpu.trace_start"() <{level = 10 : i32, message = "hqd,hkd->hqk"}> : () -> ()
    %cst_25 = arith.constant dense<0.000000e+00> : vector<4x8x8xf32>
    %27 = tpu.matmul %25, %26, %cst_25 {dimension_numbers = #tpu.dot_dimension_numbers<[2], [2], [1], [1], [0, 0, 0, 1, 1, 1], [0], [0]>} : vector<4x8x8xbf16>, vector<4x8x8xbf16>, vector<4x8x8xf32> -> vector<4x8x8xf32>
    "tpu.trace_stop"() : () -> ()
    %cst_26 = arith.constant 0.353553385 : f32
    %28 = vector.broadcast %cst_26 : f32 to vector<4x8x8xf32>
    %29 = arith.mulf %27, %28 : vector<4x8x8xf32>
    %c0_27 = arith.constant 0 : index
    %c0_28 = arith.constant 0 : index
    %c0_29 = arith.constant 0 : index
    %30 = vector.load %arg3[%c0_27, %c0_28, %c0_29] : memref<1x1x8xi32, #tpu.memory_space<vmem>>, vector<1x1x8xi32>
    %31 = vector.shape_cast %30 : vector<1x1x8xi32> to vector<1x8xi32>
    %c0_i32 = arith.constant 0 : i32
    %32 = vector.broadcast %c0_i32 : i32 to vector<1x8xi32>
    %33 = arith.cmpi ne, %31, %32 : vector<1x8xi32>
    %cst_30 = arith.constant 0.000000e+00 : f32
    %cst_31 = arith.constant -1.000000e+30 : f32
    %34 = vector.broadcast %cst_30 : f32 to vector<1x8xf32>
    %35 = vector.broadcast %cst_31 : f32 to vector<1x8xf32>
    %36 = arith.select %33, %34, %35 : vector<1x8xi1>, vector<1x8xf32>
    %37 = vector.shape_cast %36 : vector<1x8xf32> to vector<1x1x8xf32>
    %38 = vector.broadcast %37 : vector<1x1x8xf32> to vector<4x8x8xf32>
    %39 = arith.addf %29, %38 : vector<4x8x8xf32>
    %cst_32 = arith.constant dense<0xFF800000> : vector<4x8xf32>
    %40 = vector.multi_reduction <maximumf>, %39, %cst_32 [2] : vector<4x8x8xf32> to vector<4x8xf32>
    %41 = vector.shape_cast %40 : vector<4x8xf32> to vector<4x8x1xf32>
    %42 = vector.broadcast %41 : vector<4x8x1xf32> to vector<4x8x8xf32>
    %43 = arith.subf %39, %42 : vector<4x8x8xf32>
    %44 = math.exp %43 : vector<4x8x8xf32>
    %cst_33 = arith.constant dense<0.000000e+00> : vector<4x8xf32>
    %45 = vector.multi_reduction <add>, %44, %cst_33 [2] : vector<4x8x8xf32> to vector<4x8xf32>
    %46 = vector.shape_cast %45 : vector<4x8xf32> to vector<4x8x1xf32>
    %47 = tpu.reciprocal %46 {approx = true} : vector<4x8x1xf32> -> vector<4x8x1xf32>
    %48 = vector.broadcast %47 : vector<4x8x1xf32> to vector<4x8x8xf32>
    %49 = arith.mulf %44, %48 : vector<4x8x8xf32>
    %50 = arith.truncf %49 : vector<4x8x8xf32> to vector<4x8x8xbf16>
    %51 = arith.truncf %24 : vector<4x8x8xf32> to vector<4x8x8xbf16>
    "tpu.trace_start"() <{level = 10 : i32, message = "hqk,hkd->hqd"}> : () -> ()
    %cst_34 = arith.constant dense<0.000000e+00> : vector<4x8x8xf32>
    %52 = tpu.matmul %50, %51, %cst_34 {dimension_numbers = #tpu.dot_dimension_numbers<[2], [1], [1], [2], [0, 0, 0, 1, 1, 2], [0], [0]>} : vector<4x8x8xbf16>, vector<4x8x8xbf16>, vector<4x8x8xf32> -> vector<4x8x8xf32>
    "tpu.trace_stop"() : () -> ()
    %53 = vector.extract_strided_slice %52 {offsets = [0, 0, 0], sizes = [1, 8, 8], strides = [1, 1, 1]} : vector<4x8x8xf32> to vector<1x8x8xf32>
    %54 = vector.shape_cast %53 : vector<1x8x8xf32> to vector<8x8xf32>
    %c0_35 = arith.constant 0 : index
    %c0_36 = arith.constant 0 : index
    %c0_37 = arith.constant 0 : index
    %55 = vector.load %arg10[%c0_35, %c0_36, %c0_37] : memref<4x8x32xf32, #tpu.memory_space<vmem>>, vector<1x8x32xf32>
    %56 = vector.shape_cast %55 : vector<1x8x32xf32> to vector<8x32xf32>
    %cst_38 = arith.constant dense<0.000000e+00> : vector<8x32xf32>
    %57 = tpu.matmul %54, %56, %cst_38 {dimension_numbers = #tpu.dot_dimension_numbers<[1], [0], [0], [1], [0, 0, 1, 1], [], []>} : vector<8x8xf32>, vector<8x32xf32>, vector<8x32xf32> -> vector<8x32xf32>
    %58 = arith.addf %1, %57 : vector<8x32xf32>
    %59 = vector.extract_strided_slice %52 {offsets = [1, 0, 0], sizes = [1, 8, 8], strides = [1, 1, 1]} : vector<4x8x8xf32> to vector<1x8x8xf32>
    %60 = vector.shape_cast %59 : vector<1x8x8xf32> to vector<8x8xf32>
    %c1 = arith.constant 1 : index
    %c0_39 = arith.constant 0 : index
    %c0_40 = arith.constant 0 : index
    %61 = vector.load %arg10[%c1, %c0_39, %c0_40] : memref<4x8x32xf32, #tpu.memory_space<vmem>>, vector<1x8x32xf32>
    %62 = vector.shape_cast %61 : vector<1x8x32xf32> to vector<8x32xf32>
    %cst_41 = arith.constant dense<0.000000e+00> : vector<8x32xf32>
    %63 = tpu.matmul %60, %62, %cst_41 {dimension_numbers = #tpu.dot_dimension_numbers<[1], [0], [0], [1], [0, 0, 1, 1], [], []>} : vector<8x8xf32>, vector<8x32xf32>, vector<8x32xf32> -> vector<8x32xf32>
    %64 = arith.addf %58, %63 : vector<8x32xf32>
    %65 = vector.extract_strided_slice %52 {offsets = [2, 0, 0], sizes = [1, 8, 8], strides = [1, 1, 1]} : vector<4x8x8xf32> to vector<1x8x8xf32>
    %66 = vector.shape_cast %65 : vector<1x8x8xf32> to vector<8x8xf32>
    %c2 = arith.constant 2 : index
    %c0_42 = arith.constant 0 : index
    %c0_43 = arith.constant 0 : index
    %67 = vector.load %arg10[%c2, %c0_42, %c0_43] : memref<4x8x32xf32, #tpu.memory_space<vmem>>, vector<1x8x32xf32>
    %68 = vector.shape_cast %67 : vector<1x8x32xf32> to vector<8x32xf32>
    %cst_44 = arith.constant dense<0.000000e+00> : vector<8x32xf32>
    %69 = tpu.matmul %66, %68, %cst_44 {dimension_numbers = #tpu.dot_dimension_numbers<[1], [0], [0], [1], [0, 0, 1, 1], [], []>} : vector<8x8xf32>, vector<8x32xf32>, vector<8x32xf32> -> vector<8x32xf32>
    %70 = arith.addf %64, %69 : vector<8x32xf32>
    %71 = vector.extract_strided_slice %52 {offsets = [3, 0, 0], sizes = [1, 8, 8], strides = [1, 1, 1]} : vector<4x8x8xf32> to vector<1x8x8xf32>
    %72 = vector.shape_cast %71 : vector<1x8x8xf32> to vector<8x8xf32>
    %c3 = arith.constant 3 : index
    %c0_45 = arith.constant 0 : index
    %c0_46 = arith.constant 0 : index
    %73 = vector.load %arg10[%c3, %c0_45, %c0_46] : memref<4x8x32xf32, #tpu.memory_space<vmem>>, vector<1x8x32xf32>
    %74 = vector.shape_cast %73 : vector<1x8x32xf32> to vector<8x32xf32>
    %cst_47 = arith.constant dense<0.000000e+00> : vector<8x32xf32>
    %75 = tpu.matmul %72, %74, %cst_47 {dimension_numbers = #tpu.dot_dimension_numbers<[1], [0], [0], [1], [0, 0, 1, 1], [], []>} : vector<8x8xf32>, vector<8x32xf32>, vector<8x32xf32> -> vector<8x32xf32>
    %76 = arith.addf %70, %75 : vector<8x32xf32>
    %77 = arith.truncf %76 : vector<8x32xf32> to vector<8x32xbf16>
    %c0_48 = arith.constant 0 : index
    %c0_49 = arith.constant 0 : index
    %78 = vector.load %arg11[%c0_48, %c0_49] : memref<32x128xbf16, #tpu.memory_space<vmem>>, vector<32x128xbf16>
    %cst_50 = arith.constant dense<0.000000e+00> : vector<8x128xf32>
    %79 = tpu.matmul %77, %78, %cst_50 {dimension_numbers = #tpu.dot_dimension_numbers<[1], [0], [0], [1], [0, 0, 1, 1], [], []>} : vector<8x32xbf16>, vector<32x128xbf16>, vector<8x128xf32> -> vector<8x128xf32>
    %c0_51 = arith.constant 0 : index
    %c0_52 = arith.constant 0 : index
    %80 = vector.load %arg12[%c0_51, %c0_52] : memref<1x128xf32, #tpu.memory_space<vmem>>, vector<1x128xf32>
    %81 = vector.broadcast %80 : vector<1x128xf32> to vector<8x128xf32>
    %82 = arith.addf %79, %81 : vector<8x128xf32>
    %cst_53 = arith.constant 0.000000e+00 : f32
    %83 = vector.broadcast %cst_53 : f32 to vector<8x128xf32>
    %84 = arith.maximumf %82, %83 : vector<8x128xf32>
    %85 = arith.truncf %84 : vector<8x128xf32> to vector<8x128xbf16>
    %c0_54 = arith.constant 0 : index
    %c0_55 = arith.constant 0 : index
    %86 = vector.load %arg13[%c0_54, %c0_55] : memref<128x32xbf16, #tpu.memory_space<vmem>>, vector<128x32xbf16>
    %cst_56 = arith.constant dense<0.000000e+00> : vector<8x32xf32>
    %87 = tpu.matmul %85, %86, %cst_56 {dimension_numbers = #tpu.dot_dimension_numbers<[1], [0], [0], [1], [0, 0, 1, 1], [], []>} : vector<8x128xbf16>, vector<128x32xbf16>, vector<8x32xf32> -> vector<8x32xf32>
    %c0_57 = arith.constant 0 : index
    %c0_58 = arith.constant 0 : index
    %88 = vector.load %arg14[%c0_57, %c0_58] : memref<1x32xf32, #tpu.memory_space<vmem>>, vector<1x32xf32>
    %89 = vector.broadcast %88 : vector<1x32xf32> to vector<8x32xf32>
    %90 = arith.addf %87, %89 : vector<8x32xf32>
    %91 = arith.addf %90, %76 : vector<8x32xf32>
    %c0_59 = arith.constant 0 : index
    %c0_60 = arith.constant 0 : index
    %c0_61 = arith.constant 0 : index
    %92 = vector.load %arg15[%c0_59, %c0_60, %c0_61] : memref<1x8x32xf32, #tpu.memory_space<vmem>>, vector<1x8x32xf32>
    %93 = vector.shape_cast %92 : vector<1x8x32xf32> to vector<8x32xf32>
    %94 = vector.shape_cast %91 : vector<8x32xf32> to vector<1x8x32xf32>
    tpu.vector_store %arg15[%c0_59, %c0_60, %c0_61], %94 {strides = array<i32>} : memref<1x8x32xf32, #tpu.memory_space<vmem>>, vector<1x8x32xf32>,
    return
  }
  func.func @transform_0(%arg0: i32) -> (i32, i32, i32) {
    %c0_i32 = arith.constant 0 : i32
    %c0_i32_0 = arith.constant 0 : i32
    %c0_i32_1 = arith.constant 0 : i32
    return %arg0, %c0_i32, %c0_i32_0 : i32, i32, i32
  }
  func.func @transform_1(%arg0: i32) -> (i32, i32, i32) {
    %c0_i32 = arith.constant 0 : i32
    %c0_i32_0 = arith.constant 0 : i32
    %c0_i32_1 = arith.constant 0 : i32
    return %arg0, %c0_i32, %c0_i32_0 : i32, i32, i32
  }
  func.func @transform_2(%arg0: i32) -> (i32, i32, i32) {
    %c0_i32 = arith.constant 0 : i32
    %c0_i32_0 = arith.constant 0 : i32
    %c0_i32_1 = arith.constant 0 : i32
    return %arg0, %c0_i32, %c0_i32_0 : i32, i32, i32
  }
  func.func @transform_3(%arg0: i32) -> (i32, i32, i32) {
    %c0_i32 = arith.constant 0 : i32
    %c0_i32_0 = arith.constant 0 : i32
    %c0_i32_1 = arith.constant 0 : i32
    %c0_i32_2 = arith.constant 0 : i32
    return %c0_i32, %c0_i32_0, %c0_i32_1 : i32, i32, i32
  }
  func.func @transform_4(%arg0: i32) -> (i32, i32, i32) {
    %c0_i32 = arith.constant 0 : i32
    %c0_i32_0 = arith.constant 0 : i32
    %c0_i32_1 = arith.constant 0 : i32
    %c0_i32_2 = arith.constant 0 : i32
    return %c0_i32, %c0_i32_0, %c0_i32_1 : i32, i32, i32
  }
  func.func @transform_5(%arg0: i32) -> (i32, i32, i32) {
    %c0_i32 = arith.constant 0 : i32
    %c0_i32_0 = arith.constant 0 : i32
    %c0_i32_1 = arith.constant 0 : i32
    %c0_i32_2 = arith.constant 0 : i32
    return %c0_i32, %c0_i32_0, %c0_i32_1 : i32, i32, i32
  }
  func.func @transform_6(%arg0: i32) -> (i32, i32, i32) {
    %c0_i32 = arith.constant 0 : i32
    %c0_i32_0 = arith.constant 0 : i32
    %c0_i32_1 = arith.constant 0 : i32
    %c0_i32_2 = arith.constant 0 : i32
    return %c0_i32, %c0_i32_0, %c0_i32_1 : i32, i32, i32
  }
  func.func @transform_7(%arg0: i32) -> (i32, i32, i32) {
    %c0_i32 = arith.constant 0 : i32
    %c0_i32_0 = arith.constant 0 : i32
    %c0_i32_1 = arith.constant 0 : i32
    %c0_i32_2 = arith.constant 0 : i32
    return %c0_i32, %c0_i32_0, %c0_i32_1 : i32, i32, i32
  }
  func.func @transform_8(%arg0: i32) -> (i32, i32, i32) {
    %c0_i32 = arith.constant 0 : i32
    %c0_i32_0 = arith.constant 0 : i32
    %c0_i32_1 = arith.constant 0 : i32
    %c0_i32_2 = arith.constant 0 : i32
    return %c0_i32, %c0_i32_0, %c0_i32_1 : i32, i32, i32
  }
  func.func @transform_9(%arg0: i32) -> (i32, i32, i32) {
    %c0_i32 = arith.constant 0 : i32
    %c0_i32_0 = arith.constant 0 : i32
    %c0_i32_1 = arith.constant 0 : i32
    %c0_i32_2 = arith.constant 0 : i32
    return %c0_i32, %c0_i32_0, %c0_i32_1 : i32, i32, i32
  }
  func.func @transform_10(%arg0: i32) -> (i32, i32) {
    %c0_i32 = arith.constant 0 : i32
    %c0_i32_0 = arith.constant 0 : i32
    %c0_i32_1 = arith.constant 0 : i32
    return %c0_i32, %c0_i32_0 : i32, i32
  }
  func.func @transform_11(%arg0: i32) -> (i32, i32) {
    %c0_i32 = arith.constant 0 : i32
    %c0_i32_0 = arith.constant 0 : i32
    %c0_i32_1 = arith.constant 0 : i32
    return %c0_i32, %c0_i32_0 : i32, i32
  }
  func.func @transform_12(%arg0: i32) -> (i32, i32) {
    %c0_i32 = arith.constant 0 : i32
    %c0_i32_0 = arith.constant 0 : i32
    %c0_i32_1 = arith.constant 0 : i32
    return %c0_i32, %c0_i32_0 : i32, i32
  }
  func.func @transform_13(%arg0: i32) -> (i32, i32) {
    %c0_i32 = arith.constant 0 : i32
    %c0_i32_0 = arith.constant 0 : i32
    %c0_i32_1 = arith.constant 0 : i32
    return %c0_i32, %c0_i32_0 : i32, i32
  }
  func.func @transform_14(%arg0: i32) -> (i32, i32, i32) {
    %c0_i32 = arith.constant 0 : i32
    %c0_i32_0 = arith.constant 0 : i32
    %c0_i32_1 = arith.constant 0 : i32
    return %arg0, %c0_i32, %c0_i32_0 : i32, i32, i32
  }
}

</mosaic_0001>

<bundles_post_ra>
// kernel: tpu_custom_call.1
= control target key start
LH: loop header
LB: loop body
LE: loop exit
PB: predicated region body
PF: predicated region fallthrough
CT: control target
= control target key end

     0   :  { %s3311_s0 = inlined_call_operand.vmem [shape: f32[2,8,32], index: 0, kind: input, shape index: {}]   ;;  %s3312_s1 = inlined_call_operand.vmem [shape: f32[2,8,32], index: 1, kind: input, shape index: {}]   ;;  %s3313_s2 = inlined_call_operand.vmem [shape: s32[2,1,8], index: 2, kind: input, shape index: {}]   ;;  %s3314_s3 = inlined_call_operand.vmem [shape: bf16[4,32,8], index: 3, kind: input, shape index: {}]   ;;  %s3315_s4 = inlined_call_operand.vmem [shape: bf16[4,32,8], index: 4, kind: input, shape index: {}]   ;;  %s3316_s5 = inlined_call_operand.vmem [shape: bf16[4,32,8], index: 5, kind: input, shape index: {}]   ;;  %s3317_s6 = inlined_call_operand.vmem [shape: f32[4,1,8], index: 6, kind: input, shape index: {}]   ;;  %s3318_s7 = inlined_call_operand.vmem [shape: f32[4,1,8], index: 7, kind: input, shape index: {}]   ;;  %s3319_s8 = inlined_call_operand.vmem [shape: f32[4,1,8], index: 8, kind: input, shape index: {}]   ;;  %s3320_s9 = inlined_call_operand.vmem [shape: f32[4,8,32], index: 9, kind: input, shape index: {}]   ;;  %s3321_s10 = inlined_call_operand.vmem [shape: bf16[32,128], index: 10, kind: input, shape index: {}]   ;;  %s3322_s11 = inlined_call_operand.vmem [shape: f32[1,128], index: 11, kind: input, shape index: {}]   ;;  %s3323_s12 = inlined_call_operand.vmem [shape: bf16[128,32], index: 12, kind: input, shape index: {}]   ;;  %s3324_s13 = inlined_call_operand.vmem [shape: f32[1,32], index: 13, kind: input, shape index: {}]   ;;  %s3325_s14 = inlined_call_operand.hbm [shape: f32[2,8,32], index: 14, kind: output, shape index: {}]  }
   0x1   :  { %3330 = sst [smem:[#allocation9_spill]] %s3311_s0 }
   0x2   :  { %19 = vsyncpa [#allocation3], 0 }
   0x3   :  { %21 = vsyncpa [#allocation3 + $0x1], 0  ;;  %s2881_s29 = smov 0   ;;  %s2883_s30 = smov 0  }
   0x4   :  { %s2885_s15 = smov 0   ;;  %s2887_s16 = smov 0  }
   0x5 LB: > { %3331 = sst [smem:[#allocation5_spill]] %s2796_s15  ;;  %s2902_s17 = sadd.s32 4294967295, %s2800_s16   ;;  %s2800_s16 = sphi %s2887_s16, %s3339_s16   ;;  %s2796_s15 = sphi %s2885_s15, %s3341_s15   ;;  %s2792_s30 = sphi %s2883_s30, %s3343_s30   ;;  %s2788_s29 = sphi %s2881_s29, %s3342_s29  }
   0x6   : > { %s2288_s18 = sadd.s32 4294967294, %s2800_s16   ;;  %s2906_s19 = sadd.s32 1, %s2800_s16  }
   0x7   : > { %3332 = sst [smem:[#allocation6_spill]] %s2906_s19  ;;  %s343_s20 = sadd.s32 1, %s2796_s15 }
   0x8   : > { %s340_s21 = ssub.s32 %s2800_s16, %s2906_s19  ;;  %p353_p0 = scmp.ne.s32.totalorder %s2796_s15, %s2792_s30 }
   0x9   : > { %p341_p1 = scmp.eq.s32.totalorder %s340_s21, 0  ;;  %p354_p2 = scmp.eq.s32.totalorder %s2902_s17, 1 }
   0xa   : > { %p359_p3 = scmp.ne.s32.totalorder %s2792_s30, %s2788_s29  ;;  %p360_p4 = scmp.eq.s32.totalorder %s2288_s18, 1 }
   0xb   : > { %s2917_s22 = scalar_select %p341_p1, %s2796_s15, %s343_s20  }
   0xc   : > { %p2919_p5 = por %p354_p2, %p353_p0  ;;  %p2923_p6 = por %p360_p4, %p359_p3 }
   0xd   : > { %3333 = sst [smem:[#allocation7_spill]] %s2917_s22  ;;  %p2291_p7 = scmp.ge.s32.totalorder %s2800_s16, 1 }
   0xe   : > { %s3335_s24 = scalar_select %p2923_p6, 1, 0 }
   0xf   : > { %p431_p8 = scmp.lt.s32.totalorder %s2800_s16, 3 }
  0x10   : > { %3336 = sst [smem:[#allocation8_spill]] %s3335_s24 }
  0x11   : > { %p432_p9 = pnand %p2291_p7, %p431_p8 }
  0x12   : > { %v2688_v0 = vld [vmem:[%s3314_s3] sm:$0xff] (!%p432_p9)   ;;  %v2802_v1 = vmov (!%p432_p9), 0.0   ;;  %v2689_v2 = vld [vmem:[%s3314_s3 + $0x30] sm:$0xff] (!%p432_p9)   ;;  %v2690_v3 = vld [vmem:[%s3314_s3 + $0x8] sm:$0xff] (!%p432_p9)   ;;  %vm2803_vm0 = vmmov (!%p432_p9), 0   ;;  %p483_p10 = scmp.lt.s32.totalorder (!%p432_p9), %s2902_s17, 1 }
  0x13   : > { %435 = sbr.rel (%p432_p9) target bundleno = 1713 (0x6b1), region = 76  ;;  %2447 = vmatprep.subr.bf16.mxu0 (!%p432_p9), %v2802_v1  ;;  %2471 = vmatprep.subr.bf16.mxu1 (!%p432_p9), %v2802_v1  ;;  %v2691_v4 = vld [vmem:[%s3314_s3 + $0x38] sm:$0xff] (!%p432_p9)   ;;  %s3337_s0 = sld [smem:[#allocation9_spill]] (!%p432_p9)  ;;  %v2692_v5 = vld [vmem:[%s3314_s3 + $0x10] sm:$0xff] (!%p432_p9)   ;;  %vm555_vm1 = vcmask (!%p432_p9), 261120   ;;  %v2696_v13 = vld [vmem:[%s3314_s3 + $0x20] sm:$0xff] (!%p432_p9)  }
  0x14   : > { %2448 = vmatpush3.bf16.msra.mxu0 (!%p432_p9), %v2688_v0  ;;  %2451 = vmatprep.mubr.msk.bf16.mxu0 (!%p432_p9), %vm2803_vm0, %v2802_v1  ;;  %v2693_v7 = vld [vmem:[%s3315_s4 + $0x10] sm:$0xff] (!%p432_p9)   ;;  %v2694_v9 = vld [vmem:[%s3314_s3 + $0x18] sm:$0xff] (!%p432_p9)   ;;  %v2698_v15 = vld [vmem:[%s3314_s3 + $0x28] sm:$0xff] (!%p432_p9)   ;;  %vm1270_vm2 = vcmask (!%p432_p9), 64512   ;;  %vm1527_vm3 = vcmask (!%p432_p9), 1043456   ;;  %s480_s22 = sand.u32 (!%p432_p9), 1, %s2792_s30  }
  0x15   : > { %2472 = vmatpush3.bf16.msra.mxu1 (!%p432_p9), %v2689_v2  ;;  %2449 = vmatprep.subr.bf16.mxu0 (!%p432_p9), %v2802_v1  ;;  %v2695_v10 = vld [vmem:[%s3315_s4 + $0x18] sm:$0xff] (!%p432_p9)   ;;  %v2697_v14 = vld [vmem:[%s3315_s4 + $0x30] sm:$0xff] (!%p432_p9)   ;;  %v2700_v17 = vld [vmem:[%s3315_s4] sm:$0xff] (!%p432_p9)   ;;  %s2372_s15 = sshll.u32 (!%p432_p9), %s2902_s17, 7  ;;  %s2805_s18 = smov (!%p432_p9), [#allocation2]  }
  0x16   : > { %2473 = vmatprep.subr.bf16.mxu1 (!%p432_p9), %v2802_v1  ;;  %2475 = vmatprep.mubr.msk.bf16.mxu1 (!%p432_p9), %vm2803_vm0, %v2802_v1  ;;  %v2699_v16 = vld [vmem:[%s3315_s4 + $0x38] sm:$0xff] (!%p432_p9)   ;;  %v2704_v18 = vld [vmem:[%s3316_s5 + $0x10] sm:$0xff] (!%p432_p9)   ;;  %v2701_v19 = vld [vmem:[%s3315_s4 + $0x8] sm:$0xff] (!%p432_p9)   ;;  %s3268_s25 = scalar_lea.hbm (!%p432_p9), %s3325_s14, %s2372_s15 }
  0x17   : > { %v2705_v20 = vld [vmem:[%s3316_s5 + $0x18] sm:$0xff] (!%p432_p9)   ;;  %v2702_v21 = vld [vmem:[%s3315_s4 + $0x20] sm:$0xff] (!%p432_p9)   ;;  %v2703_v22 = vld [vmem:[%s3315_s4 + $0x28] sm:$0xff] (!%p432_p9)  }
  0x18   : > { %2450 = vmatpush3.bf16.msra.mxu0 (!%p432_p9), %v2690_v3  ;;  %v2706_v23 = vld [vmem:[%s3316_s5 + $0x30] sm:$0xff] (!%p432_p9)   ;;  %v2707_v24 = vld [vmem:[%s3316_s5 + $0x38] sm:$0xff] (!%p432_p9)   ;;  %v2708_v25 = vld [vmem:[%s3316_s5] sm:$0xff] (!%p432_p9)  }
  0x19   : > { %2474 = vmatpush3.bf16.msra.mxu1 (!%p432_p9), %v2691_v4  ;;  %2455 = vmatprep.subr.bf16.mxu0 (!%p432_p9), %v2802_v1  ;;  %v2709_v26 = vld [vmem:[%s3316_s5 + $0x8] sm:$0xff] (!%p432_p9)   ;;  %v2710_v27 = vld [vmem:[%s3316_s5 + $0x20] sm:$0xff] (!%p432_p9)  }
  0x1a   : > { %s2951_s26 = scalar_select %p483_p10, %s2902_s17, 1  ;;  %2487 = vmatprep.subr.bf16.mxu1 %v2802_v1  ;;  %v2711_v28 = vld [vmem:[%s3316_s5 + $0x28] sm:$0xff]   ;;  %v2312_v37 = vld [vmem:[%s3318_s7 + $0x1] ss:$0 sm:$0xff]  ;;  %v2314_v50 = vld [vmem:[%s3318_s7 + $0x3] ss:$0 sm:$0xff] }
  0x1b   : > { %v2296_v48 = vld [vmem:[%s3317_s6 + $0x1] ss:$0 sm:$0xff]  ;;  %v2298_v57 = vld [vmem:[%s3317_s6 + $0x3] ss:$0 sm:$0xff]  ;;  %v2311_v3 = vld [vmem:[%s3318_s7] ss:$0 sm:$0xff] }
  0x1c   : > { %s2293_s27 = sshll.u32 %s2951_s26, 3  ;;  %s2195_s17 = scalar_lea.sflag [#allocation3], %s480_s22 }
  0x1d   : > { %s486_s20 = scalar_lea.vmem %s3337_s0, %s2293_s27  ;;  %s490_s28 = scalar_lea.vmem %s3312_s1, %s2293_s27 }
  0x1e   : > { %v2961_v6 = vld [vmem:[%s486_s20] sm:$0xff]  ;;  %s493_s20 = scalar_lea.vmem %s3313_s2, %s2951_s26 }
  0x1f   : > { %v497_v8 = vpack.c.bf16 %v2961_v6, %v2961_v6  ;;  %v496_v11 = vld [vmem:[%s490_s28] sm:$0xff] }
  0x20   : > { %v2986_v12 = vpack.c.bf16 %v496_v11, %v496_v11 }
  0x21   : > { %2452 = vmatmul.mubr.msk.bf16.vlgmr.msra.gmra.mrb[0].mxu0 %vm555_vm1, %v497_v8  ;;  %2476 = vmatmul.mubr.msk.bf16.vlgmr.msra.gmra.mrb[0].mxu1 %vm555_vm1, %v497_v8 }
  0x22   : > { %2456 = vmatpush3.bf16.msra.mxu0 %v2692_v5  ;;  %2488 = vmatpush3.bf16.msra.mxu1 %v2693_v7  ;;  %v2328_v5 = vld [vmem:[%s3319_s8 + $0x1] ss:$0 sm:$0xff] }
  0x23   : > { %2457 = vmatprep.subr.bf16.mxu0 %v2802_v1  ;;  %2489 = vmatprep.subr.bf16.mxu1 %v2802_v1 }
  0x24   : > { %2459 = vmatprep.mubr.msk.bf16.mxu0 %vm2803_vm0, %v2802_v1  ;;  %2491 = vmatprep.mubr.msk.bf16.mxu1 %vm2803_vm0, %v2802_v1 }
  0x26   : > { %2458 = vmatpush3.bf16.msra.mxu0 %v2694_v9  ;;  %2490 = vmatpush3.bf16.msra.mxu1 %v2695_v10 }
  0x27   : > { %2463 = vmatprep.subr.bf16.mxu0 %v2802_v1  ;;  %2503 = vmatprep.subr.bf16.mxu1 %v2802_v1 }
  0x29   : > { %2460 = vmatmul.mubr.msk.bf16.vlgmr.msra.gmra.mrb[4].mxu0 %vm555_vm1, %v497_v8  ;;  %2492 = vmatmul.mubr.msk.bf16.vlgmr.msra.gmra.mrb[4].mxu1 %vm555_vm1, %v2986_v12 }
  0x2a   : > { %2464 = vmatpush3.bf16.msra.mxu0 %v2696_v13  ;;  %2504 = vmatpush3.bf16.msra.mxu1 %v2697_v14 }
  0x2b   : > { %2465 = vmatprep.subr.bf16.mxu0 %v2802_v1  ;;  %2505 = vmatprep.subr.bf16.mxu1 %v2802_v1 }
  0x2c   : > { %2467 = vmatprep.mubr.msk.bf16.mxu0 %vm2803_vm0, %v2802_v1  ;;  %2507 = vmatprep.mubr.msk.bf16.mxu1 %vm2803_vm0, %v2802_v1 }
  0x2e   : > { %2466 = vmatpush3.bf16.msra.mxu0 %v2698_v15  ;;  %2506 = vmatpush3.bf16.msra.mxu1 %v2699_v16  ;;  %v2295_v16 = vld [vmem:[%s3317_s6] ss:$0 sm:$0xff] }
  0x2f   : > { %2479 = vmatprep.subr.bf16.mxu0 %v2802_v1  ;;  %2519 = vmatprep.subr.bf16.mxu1 %v2802_v1 }
  0x31   : > { %2468 = vmatmul.mubr.msk.bf16.vlgmr.msra.gmra.mrb[8].mxu0 %vm555_vm1, %v497_v8  ;;  %2508 = vmatmul.mubr.msk.bf16.vlgmr.msra.gmra.mrb[8].mxu1 %vm555_vm1, %v2986_v12 }
  0x32   : > { %2480 = vmatpush3.bf16.msra.mxu0 %v2700_v17  ;;  %2483 = vmatprep.mubr.msk.bf16.mxu0 %vm2803_vm0, %v2802_v1 }
  0x33   : > { %2481 = vmatprep.subr.bf16.mxu0 %v2802_v1  ;;  %2520 = vmatpush3.bf16.msra.mxu1 %v2704_v18 }
  0x34   : > { %2521 = vmatprep.subr.bf16.mxu1 %v2802_v1  ;;  %2523 = vmatprep.mubr.msk.bf16.mxu1 %vm2803_vm0, %v2802_v1 }
  0x36   : > { %2482 = vmatpush3.bf16.msra.mxu0 %v2701_v19 }
  0x37   : > { %2495 = vmatprep.subr.bf16.mxu0 %v2802_v1  ;;  %2522 = vmatpush3.bf16.msra.mxu1 %v2705_v20 }
  0x38   : > { %2535 = vmatprep.subr.bf16.mxu1 %v2802_v1 }
  0x39   : > { %2484 = vmatmul.mubr.msk.bf16.vlgmr.msra.gmra.mrb[12].mxu0 %vm555_vm1, %v2986_v12 }
  0x3a   : > { %2496 = vmatpush3.bf16.msra.mxu0 %v2702_v21  ;;  %2499 = vmatprep.mubr.msk.bf16.mxu0 %vm2803_vm0, %v2802_v1  ;;  %v2313_v21 = vld [vmem:[%s3318_s7 + $0x2] ss:$0 sm:$0xff] }
  0x3b   : > { %2497 = vmatprep.subr.bf16.mxu0 %v2802_v1  ;;  %2524 = vmatmul.mubr.msk.bf16.vlgmr.msra.gmra.mrb[12].mxu1 %vm555_vm1, %v2986_v12 }
  0x3c   : > { %2539 = vmatprep.mubr.msk.bf16.mxu1 %vm2803_vm0, %v2802_v1  ;;  %2536 = vmatpush3.bf16.msra.mxu1 %v2706_v23 }
  0x3d   : > { %2537 = vmatprep.subr.bf16.mxu1 %v2802_v1 }
  0x3e   : > { %2498 = vmatpush3.bf16.msra.mxu0 %v2703_v22 }
  0x3f   : > { %2511 = vmatprep.subr.bf16.mxu0 %v2802_v1 }
  0x40   : > { %2538 = vmatpush3.bf16.msra.mxu1 %v2707_v24 }
  0x41   : > { %2500 = vmatmul.mubr.msk.bf16.vlgmr.msra.gmra.mrb[16].mxu0 %vm555_vm1, %v2986_v12  ;;  %2549 = vmatprep.subr.bf16.mxu1 %v2802_v1 }
  0x42   : > { %2515 = vmatprep.mubr.msk.bf16.mxu0 %vm2803_vm0, %v2802_v1  ;;  %2512 = vmatpush3.bf16.msra.mxu0 %v2708_v25 }
  0x43   : > { %2513 = vmatprep.subr.bf16.mxu0 %v2802_v1  ;;  %2540 = vmatmul.mubr.msk.bf16.vlgmr.msra.gmra.mrb[16].mxu1 %vm555_vm1, %v2986_v12 }
  0x44   : > { %2551 = vmatprep.mubr.msk.bf16.mxu1 %vm2803_vm0, %v2802_v1 }
  0x46   : > { %2514 = vmatpush3.bf16.msra.mxu0 %v2709_v26 }
  0x47   : > { %2527 = vmatprep.subr.bf16.mxu0 %v2802_v1 }
  0x49   : > { %2516 = vmatmul.mubr.msk.bf16.vlgmr.msra.gmra.mrb[20].mxu0 %vm555_vm1, %v2986_v12 }
  0x4a   : > { %2531 = vmatprep.mubr.msk.bf16.mxu0 %vm2803_vm0, %v2802_v1  ;;  %2528 = vmatpush3.bf16.msra.mxu0 %v2710_v27 }
  0x4b   : > { %2529 = vmatprep.subr.bf16.mxu0 %v2802_v1 }
  0x4e   : > { %2530 = vmatpush3.bf16.msra.mxu0 %v2711_v28 }
  0x4f   : > { %2543 = vmatprep.subr.bf16.mxu0 %v2802_v1 }
  0x51   : > { %2532 = vmatmul.mubr.msk.bf16.vlgmr.msra.gmra.mrb[24].mxu0 %vm555_vm1, %v2986_v12 }
  0x52   : > { %2545 = vmatprep.mubr.msk.bf16.mxu0 %vm2803_vm0, %v2802_v1 }
  0xf4   : > { %v3092_v29 = vpop.f32.mrb[0].mxu0  ;;  %v749_v30 = vpop.f32.mrb[0].mxu1 }
  0xf5   : > { %v2453_v31 = vpop.f32.mrb[1].mxu0  ;;  %v2477_v32 = vpop.f32.mrb[1].mxu1  ;;  %v750_v0 = vadd.f32 %v2298_v57, %v749_v30  ;;  %v594_v22 = vadd.f32 %v2295_v16, %v3092_v29  ;;  %v1459_v57 = vld [vmem:[%s493_s20] sm:$0x1]  ;;  %s2292_s20 = sshll.u32 %s480_s22, 3 }
  0xf6   : > { %v596_v33 = vpop.f32.mrb[2].mxu0  ;;  %v752_v34 = vpop.f32.mrb[2].mxu1  ;;  %v2297_v32 = vld [vmem:[%s3317_s6 + $0x2] ss:$0 sm:$0xff]  ;;  %vm1460_vm4 = vcmp.ne.s32.totalorder %v1459_v57, 0  ;;  %s482_s19 = scalar_lea.vmem [#allocation2], %s2292_s20 }
  0xf7   : > { %v2454_v35 = vpop.f32.mrb[3].mxu0  ;;  %v2478_v36 = vpop.f32.mrb[3].mxu1  ;;  %v1265_v7 = vpack.c.bf16 %v750_v0, %v750_v0  ;;  %v1262_v28 = vpack.c.bf16 %v594_v22, %v594_v22  ;;  %s2208_s24 = sshll.u32 %s482_s19, 4  ;;  %s2742_s20 = sshll.u32 %s2805_s18, 4  ;;  %s3270_s24 = int_to_ptr.vmem [resolvable:$true] %s2208_s24  ;;  %s2743_s20 = int_to_ptr.vmem [resolvable:$false] %s2742_s20 }
  0xf8   : > { %s2738_s28 = scalar_lea.vmem %s3270_s24, 128  ;;  %s2744_s26 = scalar_lea.vmem %s2743_s20, 256 }
  0xf9   : > { %p2739_p11 = scmp.ne.s32.totalorder %s3270_s24, %s2738_s28  ;;  %p2745_p0 = scmp.lt.s32.totalorder %s3270_s24, %s2743_s20 }
  0xfa   : > { %p2746_p1 = scmp.lt.s32.totalorder %s2744_s26, %s2738_s28 }
  0xfb   : > { %p2740_p12 = pnand %p2739_p11, %p2919_p5 }
  0xfc   : > { %v645_v38 = vpop.f32.mrb[4].mxu0  ;;  %v900_v39 = vpop.f32.mrb[4].mxu1  ;;  %p2747_p2 = por %p2746_p1, %p2745_p0 }
  0xfd   : > { %v901_v40 = vadd.f32 %v2312_v37, %v900_v39  ;;  %v2461_v41 = vpop.f32.mrb[5].mxu0  ;;  %v2493_v42 = vpop.f32.mrb[5].mxu1  ;;  %v646_v51 = vadd.f32 %v2296_v48, %v645_v38  ;;  %v2327_v39 = vld [vmem:[%s3319_s8] ss:$0 sm:$0xff]  ;;  %p2741_p13 = pneg %p2740_p12 }
  0xfe   : > { %v648_v43 = vpop.f32.mrb[6].mxu0  ;;  %v903_v44 = vpop.f32.mrb[6].mxu1 }
  0xff   : > { %v1267_v45 = vpack.c.bf16 %v901_v40, %v901_v40  ;;  %v2462_v46 = vpop.f32.mrb[7].mxu0  ;;  %v2494_v47 = vpop.f32.mrb[7].mxu1  ;;  %v1263_v60 = vpack.c.bf16 %v646_v51, %v646_v51  ;;  %p2748_p3 = pnand %p2747_p2, %p2741_p13 }
 0x101   : > { %v1321_v49 = vsel %vm1270_vm2, %v1267_v45, 0 }
 0x102   : > { %2550 = vmatpush3.bf16.xpose.msra.mxu1 %v1321_v49 }
 0x103   : > { %2561 = vmatprep.subr.bf16.mxu1 %v2802_v1 }
 0x104   : > { %v697_v52 = vpop.f32.mrb[8].mxu0  ;;  %v1004_v53 = vpop.f32.mrb[8].mxu1 }
 0x105   : > { %v1005_v54 = vadd.f32 %v2314_v50, %v1004_v53  ;;  %v2469_v55 = vpop.f32.mrb[9].mxu0  ;;  %v2509_v56 = vpop.f32.mrb[9].mxu1  ;;  %v698_v33 = vadd.f32 %v2297_v32, %v697_v52 }
 0x106   : > { %v700_v58 = vpop.f32.mrb[10].mxu0  ;;  %v1007_v59 = vpop.f32.mrb[10].mxu1  ;;  %v1463_v55 = vlaneseq }
 0x107   : > { %v1269_v61 = vpack.c.bf16 %v1005_v54, %v1005_v54  ;;  %v2470_v62 = vpop.f32.mrb[11].mxu0  ;;  %v2510_v63 = vpop.f32.mrb[11].mxu1  ;;  %v1264_v34 = vpack.c.bf16 %v698_v33, %v698_v33 }
 0x108   : > { %v1464_v59 = vshrl.u32 %v1463_v55, 7  ;;  %v2804_v63 = vmov -1e+30  }
 0x109   : > { %v1413_v2 = vsel %vm1270_vm2, %v1269_v61, 0  ;;  %2552 = vmatmul.mubr.msk.bf16.vlgmr.msra.gmra.mrb[20].mxu1 %vm1270_vm2, %v1263_v60  ;;  %v1461_v0 = vsel %vm1460_vm4, 0.0, %v2804_v63 }
 0x10a   : > { %2562 = vmatpush3.bf16.xpose.msra.mxu1 %v1413_v2  ;;  %2563 = vmatprep.mubr.msk.bf16.mxu1 %vm2803_vm0, %v2802_v1  ;;  %v1465_v62 = vsub.s32 0, %v1464_v59 }
 0x10b   : > { %2573 = vmatprep.subr.bf16.mxu1 %v2802_v1 }
 0x10c   : > { %v848_v4 = vpop.f32.mrb[12].mxu0 }
 0x10d   : > { %v849_v8 = vadd.f32 %v2311_v3, %v848_v4  ;;  %v2485_v9 = vpop.f32.mrb[13].mxu0 }
 0x10e   : > { %v851_v10 = vpop.f32.mrb[14].mxu0  ;;  %v1152_v11 = vpop.f32.mrb[12].mxu1 }
 0x10f   : > { %v1266_v12 = vpack.c.bf16 %v849_v8, %v849_v8  ;;  %v2486_v13 = vpop.f32.mrb[15].mxu0  ;;  %v1153_v14 = vadd.f32 %v2328_v5, %v1152_v11  ;;  %v2525_v15 = vpop.f32.mrb[13].mxu1 }
 0x110   : > { %v1155_v17 = vpop.f32.mrb[14].mxu1 }
 0x111   : > { %v1275_v18 = vsel %vm1270_vm2, %v1266_v12, 0  ;;  %2564 = vmatmul.mubr.msk.bf16.vlgmr.msra.gmra.mrb[24].mxu1 %vm1270_vm2, %v1265_v7  ;;  %v1521_v19 = vpack.c.bf16 %v1153_v14, %v1153_v14  ;;  %v2526_v20 = vpop.f32.mrb[15].mxu1  ;;  %v1466_v7 = vrot.slane %v1461_v0, %v1465_v62 }
 0x112   : > { %2544 = vmatpush3.bf16.xpose.msra.mxu0 %v1275_v18  ;;  %2575 = vmatprep.mubr.msk.bf16.mxu1 %vm2803_vm0, %v2802_v1 }
 0x113   : > { %2555 = vmatprep.subr.bf16.mxu0 %v2802_v1  ;;  %v1575_v23 = vsel %vm1527_vm3, %v1521_v19, 0 }
 0x114   : > { %v952_v24 = vpop.f32.mrb[16].mxu0  ;;  %2574 = vmatpush3.bf16.msra.mxu1 %v1575_v23 }
 0x115   : > { %v953_v25 = vadd.f32 %v2313_v21, %v952_v24  ;;  %v2501_v26 = vpop.f32.mrb[17].mxu0  ;;  %2585 = vmatprep.subr.bf16.mxu1 %v2802_v1 }
 0x116   : > { %v955_v27 = vpop.f32.mrb[18].mxu0  ;;  %v3144_v35 = vpop.f32.mrb[16].mxu1 }
 0x117   : > { %v1268_v30 = vpack.c.bf16 %v953_v25, %v953_v25  ;;  %v2502_v31 = vpop.f32.mrb[19].mxu0  ;;  %v2541_v36 = vpop.f32.mrb[17].mxu1 }
 0x118   : > { %v1259_v37 = vpop.f32.mrb[18].mxu1 }
 0x119   : > { %v1367_v29 = vsel %vm1270_vm2, %v1268_v30, 0  ;;  %2546 = vmatmul.mubr.msk.bf16.vlgmr.msra.gmra.mrb[28].mxu0 %vm1270_vm2, %v1262_v28  ;;  %v2542_v38 = vpop.f32.mrb[19].mxu1 }
 0x11a   : > { %2556 = vmatpush3.bf16.xpose.msra.mxu0 %v1367_v29  ;;  %2557 = vmatprep.mubr.msk.bf16.mxu0 %vm2803_vm0, %v2802_v1 }
 0x11b   : > { %2567 = vmatprep.subr.bf16.mxu0 %v2802_v1 }
 0x11c   : > { %v1100_v40 = vpop.f32.mrb[20].mxu0 }
 0x11d   : > { %v1101_v41 = vadd.f32 %v2327_v39, %v1100_v40  ;;  %v2517_v42 = vpop.f32.mrb[21].mxu0 }
 0x11e   : > { %v1103_v43 = vpop.f32.mrb[22].mxu0 }
 0x11f   : > { %v1520_v44 = vpack.c.bf16 %v1101_v41, %v1101_v41  ;;  %v2518_v45 = vpop.f32.mrb[23].mxu0 }
 0x121   : > { %2558 = vmatmul.mubr.msk.bf16.vlgmr.msra.gmra.mrb[32].mxu0 %vm1270_vm2, %v1264_v34  ;;  %v1529_v46 = vsel %vm1527_vm3, %v1520_v44, 0 }
 0x122   : > { %2569 = vmatprep.mubr.msk.bf16.mxu0 %vm2803_vm0, %v2802_v1  ;;  %2568 = vmatpush3.bf16.msra.mxu0 %v1529_v46 }
 0x123   : > { %2579 = vmatprep.subr.bf16.mxu0 %v2802_v1 }
 0x124   : > { %v3151_v47 = vpop.f32.mrb[24].mxu0 }
 0x125   : > { %v2533_v48 = vpop.f32.mrb[25].mxu0 }
 0x126   : > { %v1207_v49 = vpop.f32.mrb[26].mxu0  ;;  %v2329_v48 = vld [vmem:[%s3319_s8 + $0x2] ss:$0 sm:$0xff] }
 0x127   : > { %v2534_v50 = vpop.f32.mrb[27].mxu0  ;;  %v1205_v49 = vadd.f32 %v2329_v48, %v3151_v47 }
 0x1dc   : > { %v1357_v51 = vpop.f32.mrb[20].mxu1 }
 0x1dd   : > { %v2553_v52 = vpop.f32.mrb[21].mxu1  ;;  %v1456_v3 = vmul.f32 0.35355338, %v1357_v51  ;;  %v2330_v51 = vld [vmem:[%s3319_s8 + $0x3] ss:$0 sm:$0xff] }
 0x1de   : > { %v1360_v53 = vpop.f32.mrb[22].mxu1 }
 0x1df   : > { %v2554_v54 = vpop.f32.mrb[23].mxu1  ;;  %v1469_v12 = vadd.f32 %v1466_v7, %v1456_v3  ;;  %v1257_v53 = vadd.f32 %v2330_v51, %v3144_v35 }
 0x1e0   : > { %v1522_v54 = vpack.c.bf16 %v1205_v49, %v1205_v49 }
 0x1e1   : > { %v1475_v17 = vsel %vm1270_vm2, %v1469_v12, -inf  ;;  %v1523_v59 = vpack.c.bf16 %v1257_v53, %v1257_v53 }
 0x1e3   : > { %v1667_v62 = vsel %vm1527_vm3, %v1523_v59, 0 }
 0x1e4   : > { %v1449_v56 = vpop.f32.mrb[24].mxu1 }
 0x1e5   : > { %v2565_v58 = vpop.f32.mrb[25].mxu1  ;;  %v1458_v14 = vmul.f32 0.35355338, %v1449_v56 }
 0x1e6   : > { %v1452_v60 = vpop.f32.mrb[26].mxu1 }
 0x1e7   : > { %v2566_v61 = vpop.f32.mrb[27].mxu1  ;;  %v1471_v22 = vadd.f32 %v1466_v7, %v1458_v14  ;;  %v1621_v60 = vsel %vm1527_vm3, %v1522_v54, 0 }
 0x1e9   : > { %v1481_v23 = vsel %vm1270_vm2, %v1471_v22, -inf }
 0x1ec   : > { %v1311_v2 = vpop.f32.mrb[28].mxu0 }
 0x1ed   : > { %v1455_v4 = vmul.f32 0.35355338, %v1311_v2  ;;  %v2547_v5 = vpop.f32.mrb[29].mxu0  ;;  %v1709_v2 = vld [vmem:[%s3320_s9] sm:$0xff] }
 0x1ee   : > { %v1314_v8 = vpop.f32.mrb[30].mxu0 }
 0x1ef   : > { %v2548_v9 = vpop.f32.mrb[31].mxu0  ;;  %v1468_v10 = vadd.f32 %v1466_v7, %v1455_v4  ;;  %v2352_v8 = vld [vmem:[%s3320_s9 + $0x8] sm:$0xff] }
 0x1f1   : > { %v1472_v11 = vsel %vm1270_vm2, %v1468_v10, -inf }
 0x1f2   : > { %1473 = vmax.xlane.f32.xlu0 %v1472_v11 }
 0x1f4   : > { %v1403_v13 = vpop.f32.mrb[32].mxu0 }
 0x1f5   : > { %v1457_v15 = vmul.f32 0.35355338, %v1403_v13  ;;  %v2559_v16 = vpop.f32.mrb[33].mxu0 }
 0x1f6   : > { %1476 = vmax.xlane.f32.xlu0 %v1475_v17  ;;  %v1406_v18 = vpop.f32.mrb[34].mxu0  ;;  %v2354_v17 = vld [vmem:[%s3320_s9 + $0x10] sm:$0xff] }
 0x1f7   : > { %v2560_v19 = vpop.f32.mrb[35].mxu0  ;;  %v1470_v20 = vadd.f32 %v1466_v7, %v1457_v15  ;;  %v2712_v7 = vld [vmem:[%s3321_s10] sm:$0xff]  }
 0x1f9   : > { %v1478_v21 = vsel %vm1270_vm2, %v1470_v20, -inf }
 0x1fa   : > { %1479 = vmax.xlane.f32.xlu1 %v1478_v21 }
 0x1fe   : > { %1482 = vmax.xlane.f32.xlu1 %v1481_v23 }
 0x27f   : > { %v1474_v24 = vpop.xlane.xlu0 %1473 }
 0x280   : > { %v1484_v25 = vsub.f32 %v1468_v10, %v1474_v24 }
 0x282   : > { %v1488_v26 = vmul.f32 1.442695, %v1484_v25 }
 0x283   : > { %v1477_v27 = vpop.xlane.xlu0 %1476 }
 0x284   : > { %2722 = vpow2.f32 %v1488_v26  ;;  %v1485_v28 = vsub.f32 %v1469_v12, %v1477_v27  ;;  %v2356_v26 = vld [vmem:[%s3320_s9 + $0x18] sm:$0xff]  ;;  %v2713_v27 = vld [vmem:[%s3321_s10 + $0x8] sm:$0xff]  }
 0x286   : > { %v1490_v30 = vmul.f32 1.442695, %v1485_v28 }
 0x287   : > { %v1480_v31 = vpop.xlane.xlu1 %1479 }
 0x288   : > { %2724 = vpow2.f32 %v1490_v30  ;;  %v1486_v32 = vsub.f32 %v1470_v20, %v1480_v31 }
 0x28a   : > { %v1492_v29 = vmul.f32 1.442695, %v1486_v32  ;;  %v2714_v32 = vld [vmem:[%s3323_s12] sm:$0xff]  }
 0x28b   : > { %v1483_v33 = vpop.xlane.xlu1 %1482 }
 0x28c   : > { %2726 = vpow2.f32 %v1492_v29  ;;  %v1487_v34 = vsub.f32 %v1471_v22, %v1483_v33  ;;  %v2715_v33 = vld [vmem:[%s3323_s12 + $0x8] sm:$0xff]  }
 0x28e   : > { %v2723_v36 = vpop.eup %2722  ;;  %v1494_v37 = vmul.f32 1.442695, %v1487_v34  ;;  %v2717_v34 = vld [vmem:[%s3323_s12 + $0x18] sm:$0xff]  }
 0x28f   : > { %v1496_v38 = vsel %vm1270_vm2, %v2723_v36, 0.0 }
 0x290   : > { %2728 = vpow2.f32 %v1494_v37  ;;  %1497 = vadd.xlane.f32.xlu0 %v1496_v38  ;;  %v2719_v37 = vld [vmem:[%s3323_s12 + $0x28] sm:$0xff]   ;;  %v2720_v38 = vld [vmem:[%s3323_s12 + $0x30] sm:$0xff]  }
 0x292   : > { %v2725_v39 = vpop.eup %2724 }
 0x293   : > { %v1499_v40 = vsel %vm1270_vm2, %v2725_v39, 0.0 }
 0x294   : > { %1500 = vadd.xlane.f32.xlu1 %v1499_v40  ;;  %v2358_v40 = vld [vmem:[%s3322_s11] ss:$0 sm:$0xff] }
 0x296   : > { %v2727_v41 = vpop.eup %2726 }
 0x297   : > { %v1502_v42 = vsel %vm1270_vm2, %v2727_v41, 0.0 }
 0x298   : > { %1503 = vadd.xlane.f32.xlu0 %v1502_v42 }
 0x29a   : > { %v2729_v43 = vpop.eup %2728 }
 0x29b   : > { %v1505_v44 = vsel %vm1270_vm2, %v2729_v43, 0.0 }
 0x29c   : > { %1506 = vadd.xlane.f32.xlu1 %v1505_v44 }
 0x31d   : > { %v1498_v45 = vpop.xlane.xlu0 %1497 }
 0x31e   : > { %2730 = vrcp.f32 %v1498_v45 }
 0x321   : > { %v1501_v46 = vpop.xlane.xlu1 %1500 }
 0x322   : > { %2732 = vrcp.f32 %v1501_v46 }
 0x325   : > { %v1504_v50 = vpop.xlane.xlu0 %1503 }
 0x326   : > { %2734 = vrcp.f32 %v1504_v50 }
 0x328   : > { %v2731_v52 = vpop.eup %2730 }
 0x329   : > { %v1512_v55 = vmul.f32 %v2731_v52, %v2723_v36  ;;  %v1507_v56 = vpop.xlane.xlu1 %1506  ;;  %v2718_v36 = vld [vmem:[%s3323_s12 + $0x20] sm:$0xff]  }
 0x32a   : > { %2736 = vrcp.f32 %v1507_v56 }
 0x32b   : > { %v1516_v57 = vpack.c.bf16 %v1512_v55, %v1512_v55 }
 0x32c   : > { %v2733_v58 = vpop.eup %2732 }
 0x32d   : > { %v1513_v61 = vmul.f32 %v2733_v58, %v2725_v39  ;;  %2570 = vmatmul.mubr.msk.bf16.vlgmr.msra.gmra.mrb[36].mxu0 %vm1270_vm2, %v1516_v57  ;;  %v2721_v39 = vld [vmem:[%s3323_s12 + $0x38] sm:$0xff]  }
 0x32e   : > { %2580 = vmatpush3.bf16.msra.mxu0 %v1621_v60  ;;  %2581 = vmatprep.mubr.msk.bf16.mxu0 %vm2803_vm0, %v2802_v1 }
 0x32f   : > { %v1517_v47 = vpack.c.bf16 %v1513_v61, %v1513_v61  ;;  %2591 = vmatprep.subr.mxu0 %v2802_v1 }
 0x330   : > { %v2735_v35 = vpop.eup %2734 }
 0x331   : > { %v1514_v63 = vmul.f32 %v2735_v35, %v2727_v41  ;;  %2576 = vmatmul.mubr.msk.bf16.vlgmr.msra.gmra.mrb[28].mxu1 %vm1270_vm2, %v1517_v47 }
 0x332   : > { %2586 = vmatpush3.bf16.msra.mxu1 %v1667_v62  ;;  %2587 = vmatprep.mubr.msk.bf16.mxu1 %vm2803_vm0, %v2802_v1 }
 0x333   : > { %v1518_v0 = vpack.c.bf16 %v1514_v63, %v1514_v63  ;;  %2611 = vmatprep.subr.bf16.mxu1 %v2802_v1 }
 0x334   : > { %v2737_v3 = vpop.eup %2736 }
 0x335   : > { %v1515_v4 = vmul.f32 %v2737_v3, %v2729_v43  ;;  %2582 = vmatmul.mubr.msk.bf16.vlgmr.msra.gmra.mrb[40].mxu0 %vm1270_vm2, %v1518_v0 }
 0x336   : > { %2592 = vmatpush3.msra.mxu0 %v1709_v2  ;;  %2593 = vmatprep.mubr.msk.f32.mxu0 %vm2803_vm0, %v2802_v1 }
 0x337   : > { %v1519_v5 = vpack.c.bf16 %v1515_v4, %v1515_v4  ;;  %2596 = vmatprep.subr.mxu0 %v2802_v1 }
 0x339   : > { %2588 = vmatmul.mubr.msk.bf16.vlgmr.msra.gmra.mrb[32].mxu1 %vm1270_vm2, %v1519_v5 }
 0x33a   : > { %2615 = vmatprep.mubr.msk.bf16.mxu1 %vm2803_vm0, %v2802_v1  ;;  %2612 = vmatpush3.bf16.msra.mxu1 %v2712_v7 }
 0x33b   : > { %2613 = vmatprep.subr.bf16.mxu1 %v2802_v1 }
 0x33e   : > { %2614 = vmatpush3.bf16.msra.mxu1 %v2713_v27 }
 0x33f   : > { %2619 = vmatprep.subr.bf16.mxu1 %v2802_v1 }
 0x400   : > { %v1565_v9 = vpop.f32.mrb[36].mxu0 }
 0x401   : > { %v2571_v10 = vpop.f32.mrb[37].mxu0  ;;  %2594 = vmatmul.mubr.msk.f32.vlgmr.msra.gmra.mrb[44].mxu0 %vm1270_vm2, %v1565_v9 }
 0x402   : > { %v1568_v11 = vpop.f32.mrb[38].mxu0  ;;  %2597 = vmatpush3.msra.mxu0 %v2352_v8  ;;  %2598 = vmatprep.mubr.msk.f32.mxu0 %vm2803_vm0, %v2802_v1 }
 0x403   : > { %v2572_v12 = vpop.f32.mrb[39].mxu0  ;;  %2601 = vmatprep.subr.mxu0 %v2802_v1 }
 0x404   : > { %v1611_v13 = vpop.f32.mrb[28].mxu1 }
 0x405   : > { %v2577_v14 = vpop.f32.mrb[29].mxu1 }
 0x406   : > { %v1614_v15 = vpop.f32.mrb[30].mxu1 }
 0x407   : > { %v2578_v16 = vpop.f32.mrb[31].mxu1 }
 0x408   : > { %v1657_v18 = vpop.f32.mrb[40].mxu0 }
 0x409   : > { %v2583_v19 = vpop.f32.mrb[41].mxu0  ;;  %2599 = vmatmul.mubr.msk.f32.vlgmr.msra.gmra.mrb[44].mxu0 %vm1270_vm2, %v1611_v13 }
 0x40a   : > { %v1660_v20 = vpop.f32.mrb[42].mxu0  ;;  %2602 = vmatpush3.msra.mxu0 %v2354_v17  ;;  %2603 = vmatprep.mubr.msk.f32.mxu0 %vm2803_vm0, %v2802_v1 }
 0x40b   : > { %v2584_v21 = vpop.f32.mrb[43].mxu0  ;;  %2606 = vmatprep.subr.mxu0 %v2802_v1 }
 0x40c   : > { %v1703_v22 = vpop.f32.mrb[32].mxu1 }
 0x40d   : > { %v2589_v23 = vpop.f32.mrb[33].mxu1 }
 0x40e   : > { %v1706_v24 = vpop.f32.mrb[34].mxu1 }
 0x40f   : > { %v2590_v25 = vpop.f32.mrb[35].mxu1 }
 0x411   : > { %2604 = vmatmul.mubr.msk.f32.vlgmr.msra.gmra.mrb[44].mxu0 %vm1270_vm2, %v1657_v18 }
 0x412   : > { %2607 = vmatpush3.msra.mxu0 %v2356_v26  ;;  %2608 = vmatprep.mubr.msk.f32.mxu0 %vm2803_vm0, %v2802_v1 }
 0x419   : > { %2609 = vmatmul.mubr.msk.f32.vlgmr.msra.gmra.mrb[44].mxu0 %vm1270_vm2, %v1703_v22 }
 0x4ec   : > { %v2007_v28 = vpop.f32.mrb[44].mxu0 }
 0x4ed   : > { %v2639_v30 = vadd.f32 %v2007_v28, %v2961_v6  ;;  %v2610_v31 = vpop.f32.mrb[45].mxu0  ;;  %v2716_v6 = vld [vmem:[%s3323_s12 + $0x10] sm:$0xff]  }
 0x4ef   : > { %v2012_v29 = vpack.c.bf16 %v2639_v30, %v2639_v30 }
 0x4f1   : > { %2616 = vmatmul.mubr.msk.bf16.vlgmr.msra.gmra.mrb[36].mxu1 %vm555_vm1, %v2012_v29 }
 0x4f2   : > { %2620 = vmatpush3.bf16.msra.mxu1 %v2714_v32  ;;  %2635 = vmatprep.mubr.msk.bf16.mxu1 %vm2803_vm0, %v2802_v1 }
 0x4f3   : > { %2621 = vmatprep.subr.bf16.mxu1 %v2802_v1 }
 0x4f6   : > { %2622 = vmatpush3.bf16.msra.mxu1 %v2715_v33 }
 0x4f7   : > { %2623 = vmatprep.subr.bf16.mxu1 %v2802_v1 }
 0x4fa   : > { %2624 = vmatpush3.bf16.msra.mxu1 %v2716_v6 }
 0x4fb   : > { %2625 = vmatprep.subr.bf16.mxu1 %v2802_v1 }
 0x4fe   : > { %2626 = vmatpush3.bf16.msra.mxu1 %v2717_v34 }
 0x4ff   : > { %2627 = vmatprep.subr.bf16.mxu1 %v2802_v1 }
 0x502   : > { %2628 = vmatpush3.bf16.msra.mxu1 %v2718_v36 }
 0x503   : > { %2629 = vmatprep.subr.bf16.mxu1 %v2802_v1 }
 0x506   : > { %2630 = vmatpush3.bf16.msra.mxu1 %v2719_v37 }
 0x507   : > { %2631 = vmatprep.subr.bf16.mxu1 %v2802_v1 }
 0x50a   : > { %2632 = vmatpush3.bf16.msra.mxu1 %v2720_v38 }
 0x50b   : > { %2633 = vmatprep.subr.bf16.mxu1 %v2802_v1  ;;  %v2362_v1 = vld [vmem:[%s3324_s13] ss:$0 sm:$0xff] }
 0x50e   : > { %2634 = vmatpush3.bf16.msra.mxu1 %v2721_v39 }
 0x5c4   : > { %v2073_v41 = vpop.f32.mrb[36].mxu1 }
 0x5c5   : > { %v2074_v42 = vadd.f32 %v2358_v40, %v2073_v41  ;;  %v2617_v43 = vpop.f32.mrb[37].mxu1 }
 0x5c6   : > { %v2076_v44 = vpop.f32.mrb[38].mxu1 }
 0x5c7   : > { %v2079_v45 = vmax.f32 %v2074_v42, 0.0  ;;  %v2618_v46 = vpop.f32.mrb[39].mxu1 }
 0x5c9   : > { %v2080_v48 = vpack.c.bf16 %v2079_v45, %v2079_v45 }
 0x5cb   : > { %2636 = vmatmul.mubr.bf16.vlgmr.msra.gmra.mrb[40].mxu1 %v2080_v48 }
 0x69e   : > { %v2186_v49 = vpop.f32.mrb[40].mxu1 }
 0x69f   : > { %v2187_v50 = vadd.f32 %v2362_v1, %v2186_v49  ;;  %v2637_v51 = vpop.f32.mrb[41].mxu1 }
 0x6a0   : > { %v2189_v52 = vpop.f32.mrb[42].mxu1 }
 0x6a1   : > { %v2192_v53 = vadd.f32 %v2639_v30, %v2187_v50  ;;  %v2638_v54 = vpop.f32.mrb[43].mxu1 }
 0x6a3   : > { %2193 = vst.msk [vmem:[%s482_s19] sm:$0xff] %vm555_vm1, %v2192_v53 }
 0x6a4   : > { %2751 = shalt.err (!%p2748_p3)
}
 0x6a5   : > { %s2752_s22 = scalar_lea.hbm %s3268_s25, 128  ;;  %s2756_s19 = scalar_lea.hbm %s3325_s14, 256 }
 0x6a6   : > { %p2753_p4 = scmp.ne.s32.totalorder %s3268_s25, %s2752_s22  ;;  %p2757_p9 = scmp.lt.u32.totalorder %s3268_s25, %s3325_s14 }
 0x6a7   : > { %p2758_p10 = scmp.lt.u32.totalorder %s2756_s19, %s2752_s22  ;;  %p2760_p12 = scmp.lt.u32.totalorder %s2752_s22, %s3268_s25 }
 0x6a8   : > { %p2754_p7 = pnand %p2753_p4, %p2919_p5 }
 0x6a9   : > { %p2759_p11 = por %p2758_p10, %p2757_p9 }
 0x6aa   : > { %p2755_p8 = pneg %p2754_p7 }
 0x6ab   : > { %p2761_p13 = por %p2760_p12, %p2759_p11 }
 0x6ad   : > { %p2762_p0 = pnand %p2761_p13, %p2755_p8 }
 0x6af   : > { %2765 = shalt.err (!%p2762_p0)
}
 0x6b0   : > { %2646 = dma.vmem_to_hbm [thread:$0]  (%p2919_p5), %s3270_s24, 128, %s3268_s25, %s2195_s17  }
 0x6b1 PF: > { %p2652_p1 = scmp.ge.s32.totalorder %s2800_s16, 2  ;;  %s2220_s18 = sand.u32 1, %s2788_s29  }
 0x6b2   : > { %s2221_s20 = scalar_lea.sflag [#allocation3], %s2220_s18 }
 0x6b3   : > { %p2649_p2 = pnand %p2652_p1, %p2923_p6 }
 0x6b5   : > { %2783 = dma.done.wait (!%p2649_p2), %s2221_s20, 128  }
 0x6b6   : > { %2785 = vsyncadd (!%p2649_p2), %s2221_s20, 4294967168  ;;  %s3339_s16 = sld [smem:[#allocation6_spill]]  ;;  %s3340_s26 = sld [smem:[#allocation5_spill]] }
 0x6b7   : > { %s3341_s15 = sld [smem:[#allocation7_spill]]  ;;  %s3342_s29 = smov %s2792_s30 }
 0x6bc   : > { %p24_p3 = scmp.ge.s32.totalorder %s3339_s16, 4   ;;  %s3343_s30 = smov %s3340_s26 }
 0x6be   :  { %26 = sbr.rel (!%p24_p3) target bundleno = 5 (0x5), region = 120 }
 0x6c5   :  { %2226 = vsyncpa [#allocation3], 1 }
 0x6c6   :  { %2228 = vsyncpa [#allocation3 + $0x1], 1 }

</bundles_post_ra>
